<compile_context>
chip_gen: v5e
topology: v5e:2x2
jax: 0.10.0
libtpu: 0.0.40
codegen_flags: <defaults>
</compile_context>

<pallas_src>
import jax
import jax.numpy as jnp
from jax.experimental import pallas as pl
from jax.experimental.pallas import tpu as pltpu

_LANE = 128
_SUB = 8
_S_MAX = 512  # (9, 512, 128) f32 = 2.25 MiB/buffer -> ~9 MiB double-buffered i/o


def _neohookean_kernel(params_ref, f_ref, o_ref):
    """params_ref: SMEM (2,) = [mu, la]; f_ref/o_ref: VMEM (9, S, 128)."""
    mu = params_ref[0]
    la = params_ref[1]

    # Dense (S, 128) slab per component (full vreg density).
    f = [f_ref[k] for k in range(9)]

    # det(F) per batch element (elementwise over the (S, 128) batch tile).
    det = (f[0] * (f[4] * f[8] - f[5] * f[7])
           - f[1] * (f[3] * f[8] - f[5] * f[6])
           + f[2] * (f[3] * f[7] - f[4] * f[6]))
    la_log_j = la * jnp.log(det)  # hoisted, reused on the 3 diagonals

    # F F^T is symmetric: compute 6 unique entries, mirror off-diagonals.
    # Direct per-component stores — no concatenate temp.
    for i in range(3):
        for j in range(i, 3):
            fft_ij = (f[3 * i + 0] * f[3 * j + 0]
                      + f[3 * i + 1] * f[3 * j + 1]
                      + f[3 * i + 2] * f[3 * j + 2])
            if i == j:
                o_ref[3 * i + j] = mu * (fft_ij - 1.0) + la_log_j
            else:
                off = mu * fft_ij
                o_ref[3 * i + j] = off
                o_ref[3 * j + i] = off


@jax.jit
def physics_forward(F, youngs_modulus_log, poissons_ratio_sigmoid):
    """F: (B, 3, 3) float32 -> Kirchhoff stress (B, 3, 3) float32."""
    B = F.shape[0]
    dtype = jnp.float32
    F = F.astype(dtype)

    # Material constants (scalar glue in plain JAX).
    E = jnp.exp(youngs_modulus_log.astype(dtype))
    nu = jax.nn.sigmoid(poissons_ratio_sigmoid.astype(dtype)) * 0.49
    mu = E / (2.0 * (1.0 + nu))
    la = E * nu / ((1.0 + nu) * (1.0 - 2.0 * nu))
    params = jnp.stack([mu, la]).astype(dtype)  # (2,) -> SMEM

    # Pad batch so the chunk count C = Bp/128 is a multiple of 8, then repack
    # to the (9, C, 128) SoA layout in a single fused pad+transpose pass.
    # Zero padding -> det = 0 -> log = -inf only in discarded padded lanes.
    Bp = ((B + _SUB * _LANE - 1) // (_SUB * _LANE)) * (_SUB * _LANE)
    C = Bp // _LANE
    x = F.reshape(B, 9)
    x = jnp.pad(x, ((0, Bp - B), (0, 0)))
    x = x.T.reshape(9, C, _LANE)
    # TODO(synk): if the surrounding pipeline can keep F in this (9, C, 128)
    # SoA layout, the pad/transpose passes at both ends disappear entirely.

    # Rows per block: as large as possible (amortize ~600-cycle step overhead)
    # while keeping >= 2 grid steps when there is enough work (v7x megacore)
    # and each buffer a few MiB (v7x 64 MiB VMEM budget).
    S = min(_S_MAX, max(_SUB, ((pl.cdiv(C, 2) + _SUB - 1) // _SUB) * _SUB))
    grid = (pl.cdiv(C, S),)

    out = pl.pallas_call(
        _neohookean_kernel,
        out_shape=jax.ShapeDtypeStruct((9, C, _LANE), dtype),
        grid=grid,
        in_specs=[
            pl.BlockSpec(memory_space=pltpu.MemorySpace.SMEM),        # [mu, la]
            pl.BlockSpec((9, S, _LANE), lambda i: (0, i, 0)),         # F slab
        ],
        out_specs=pl.BlockSpec((9, S, _LANE), lambda i: (0, i, 0)),
        compiler_params=pltpu.CompilerParams(
            dimension_semantics=("parallel",)),
    )(params, x)

    # Unpack back to (B, 3, 3) in a single fused transpose/slice pass.
    return out.reshape(9, Bp).T[:B].reshape(B, 3, 3)


def _reference(F, youngs_modulus_log, poissons_ratio_sigmoid):
    E = jnp.exp(youngs_modulus_log)
    nu = jax.nn.sigmoid(poissons_ratio_sigmoid) * 0.49
    mu = E / (2.0 * (1.0 + nu))
    la = E * nu / ((1.0 + nu) * (1.0 - 2.0 * nu))
    I = jnp.eye(3, dtype=F.dtype)[None]
    FFt = jnp.einsum("bij,bkj->bik", F, F)
    J = jnp.linalg.det(F).reshape(-1, 1, 1)
    return mu * (FFt - I) + la * jnp.log(J) * I


if __name__ == "__main__":
    key = jax.random.PRNGKey(0)

    # Deterministic "trainable" parameters (two scalar nn.Parameters).
    youngs_modulus_log = jnp.float32(10.0)      # log of Young's modulus
    poissons_ratio_sigmoid = jnp.float32(0.0)   # Poisson's ratio pre-sigmoid

    ok = True
    for B in (8, 200):  # small batches; 200 also exercises ragged padding
        kb = jax.random.fold_in(key, B)
        # Identity + small perturbation -> det(F) > 0.
        F = (jnp.eye(3, dtype=jnp.float32)[None]
             + 0.1 * jax.random.normal(kb, (B, 3, 3), dtype=jnp.float32))

        tau = physics_forward(F, youngs_modulus_log, poissons_ratio_sigmoid)
        tau = jax.block_until_ready(tau)

        ref = _reference(F, youngs_modulus_log, poissons_ratio_sigmoid)
        ok &= (tau.shape == (B, 3, 3) and tau.dtype == jnp.float32)
        ok &= bool(jnp.allclose(tau, ref, rtol=1e-4, atol=1e-3))

    assert ok, "mismatch vs reference"
    print("KERNEL_OK")
</pallas_src>

<mosaic_0001>
module attributes {stable_mosaic.version = 11 : i64} {
  func.func @_neohookean_kernel(%arg0: i32, %arg1: memref<2xf32, #tpu.memory_space<smem>>, %arg2: memref<9x8x128xf32, #tpu.memory_space<vmem>>, %arg3: memref<9x8x128xf32, #tpu.memory_space<vmem>>) attributes {dimension_semantics = [#tpu.dimension_semantics<parallel>], iteration_bounds = array<i64: 1>, scalar_prefetch = 0 : i64, scratch_operands = 0 : i64, tpu.core_type = #tpu.core_type<tc>, window_params = [{transform_indices = @transform_0, window_bounds = array<i64: 2>}, {transform_indices = @transform_1, window_bounds = array<i64: 9, 8, 128>}, {transform_indices = @transform_2, window_bounds = array<i64: 9, 8, 128>}]} {
    %c0 = arith.constant 0 : index
    %0 = memref.load %arg1[%c0] : memref<2xf32, #tpu.memory_space<smem>>
    %c1 = arith.constant 1 : index
    %1 = memref.load %arg1[%c1] : memref<2xf32, #tpu.memory_space<smem>>
    %c0_0 = arith.constant 0 : index
    %c0_1 = arith.constant 0 : index
    %c0_2 = arith.constant 0 : index
    %2 = vector.load %arg2[%c0_0, %c0_1, %c0_2] : memref<9x8x128xf32, #tpu.memory_space<vmem>>, vector<1x8x128xf32>
    %3 = vector.shape_cast %2 : vector<1x8x128xf32> to vector<8x128xf32>
    %c1_3 = arith.constant 1 : index
    %c0_4 = arith.constant 0 : index
    %c0_5 = arith.constant 0 : index
    %4 = vector.load %arg2[%c1_3, %c0_4, %c0_5] : memref<9x8x128xf32, #tpu.memory_space<vmem>>, vector<1x8x128xf32>
    %5 = vector.shape_cast %4 : vector<1x8x128xf32> to vector<8x128xf32>
    %c2 = arith.constant 2 : index
    %c0_6 = arith.constant 0 : index
    %c0_7 = arith.constant 0 : index
    %6 = vector.load %arg2[%c2, %c0_6, %c0_7] : memref<9x8x128xf32, #tpu.memory_space<vmem>>, vector<1x8x128xf32>
    %7 = vector.shape_cast %6 : vector<1x8x128xf32> to vector<8x128xf32>
    %c3 = arith.constant 3 : index
    %c0_8 = arith.constant 0 : index
    %c0_9 = arith.constant 0 : index
    %8 = vector.load %arg2[%c3, %c0_8, %c0_9] : memref<9x8x128xf32, #tpu.memory_space<vmem>>, vector<1x8x128xf32>
    %9 = vector.shape_cast %8 : vector<1x8x128xf32> to vector<8x128xf32>
    %c4 = arith.constant 4 : index
    %c0_10 = arith.constant 0 : index
    %c0_11 = arith.constant 0 : index
    %10 = vector.load %arg2[%c4, %c0_10, %c0_11] : memref<9x8x128xf32, #tpu.memory_space<vmem>>, vector<1x8x128xf32>
    %11 = vector.shape_cast %10 : vector<1x8x128xf32> to vector<8x128xf32>
    %c5 = arith.constant 5 : index
    %c0_12 = arith.constant 0 : index
    %c0_13 = arith.constant 0 : index
    %12 = vector.load %arg2[%c5, %c0_12, %c0_13] : memref<9x8x128xf32, #tpu.memory_space<vmem>>, vector<1x8x128xf32>
    %13 = vector.shape_cast %12 : vector<1x8x128xf32> to vector<8x128xf32>
    %c6 = arith.constant 6 : index
    %c0_14 = arith.constant 0 : index
    %c0_15 = arith.constant 0 : index
    %14 = vector.load %arg2[%c6, %c0_14, %c0_15] : memref<9x8x128xf32, #tpu.memory_space<vmem>>, vector<1x8x128xf32>
    %15 = vector.shape_cast %14 : vector<1x8x128xf32> to vector<8x128xf32>
    %c7 = arith.constant 7 : index
    %c0_16 = arith.constant 0 : index
    %c0_17 = arith.constant 0 : index
    %16 = vector.load %arg2[%c7, %c0_16, %c0_17] : memref<9x8x128xf32, #tpu.memory_space<vmem>>, vector<1x8x128xf32>
    %17 = vector.shape_cast %16 : vector<1x8x128xf32> to vector<8x128xf32>
    %c8 = arith.constant 8 : index
    %c0_18 = arith.constant 0 : index
    %c0_19 = arith.constant 0 : index
    %18 = vector.load %arg2[%c8, %c0_18, %c0_19] : memref<9x8x128xf32, #tpu.memory_space<vmem>>, vector<1x8x128xf32>
    %19 = vector.shape_cast %18 : vector<1x8x128xf32> to vector<8x128xf32>
    %20 = arith.mulf %11, %19 : vector<8x128xf32>
    %21 = arith.mulf %13, %17 : vector<8x128xf32>
    %22 = arith.subf %20, %21 : vector<8x128xf32>
    %23 = arith.mulf %3, %22 : vector<8x128xf32>
    %24 = arith.mulf %9, %19 : vector<8x128xf32>
    %25 = arith.mulf %13, %15 : vector<8x128xf32>
    %26 = arith.subf %24, %25 : vector<8x128xf32>
    %27 = arith.mulf %5, %26 : vector<8x128xf32>
    %28 = arith.subf %23, %27 : vector<8x128xf32>
    %29 = arith.mulf %9, %17 : vector<8x128xf32>
    %30 = arith.mulf %11, %15 : vector<8x128xf32>
    %31 = arith.subf %29, %30 : vector<8x128xf32>
    %32 = arith.mulf %7, %31 : vector<8x128xf32>
    %33 = arith.addf %28, %32 : vector<8x128xf32>
    %34 = math.log %33 : vector<8x128xf32>
    %35 = vector.broadcast %1 : f32 to vector<8x128xf32>
    %36 = arith.mulf %35, %34 : vector<8x128xf32>
    %37 = arith.mulf %3, %3 : vector<8x128xf32>
    %38 = arith.mulf %5, %5 : vector<8x128xf32>
    %39 = arith.addf %37, %38 : vector<8x128xf32>
    %40 = arith.mulf %7, %7 : vector<8x128xf32>
    %41 = arith.addf %39, %40 : vector<8x128xf32>
    %cst = arith.constant 1.000000e+00 : f32
    %42 = vector.broadcast %cst : f32 to vector<8x128xf32>
    %43 = arith.subf %41, %42 : vector<8x128xf32>
    %44 = vector.broadcast %0 : f32 to vector<8x128xf32>
    %45 = arith.mulf %44, %43 : vector<8x128xf32>
    %46 = arith.addf %45, %36 : vector<8x128xf32>
    %c0_20 = arith.constant 0 : index
    %c0_21 = arith.constant 0 : index
    %c0_22 = arith.constant 0 : index
    %47 = vector.load %arg3[%c0_20, %c0_21, %c0_22] : memref<9x8x128xf32, #tpu.memory_space<vmem>>, vector<1x8x128xf32>
    %48 = vector.shape_cast %47 : vector<1x8x128xf32> to vector<8x128xf32>
    %49 = vector.shape_cast %46 : vector<8x128xf32> to vector<1x8x128xf32>
    tpu.vector_store %arg3[%c0_20, %c0_21, %c0_22], %49 {strides = array<i32>} : memref<9x8x128xf32, #tpu.memory_space<vmem>>, vector<1x8x128xf32>,
    %50 = arith.mulf %3, %9 : vector<8x128xf32>
    %51 = arith.mulf %5, %11 : vector<8x128xf32>
    %52 = arith.addf %50, %51 : vector<8x128xf32>
    %53 = arith.mulf %7, %13 : vector<8x128xf32>
    %54 = arith.addf %52, %53 : vector<8x128xf32>
    %55 = vector.broadcast %0 : f32 to vector<8x128xf32>
    %56 = arith.mulf %55, %54 : vector<8x128xf32>
    %c1_23 = arith.constant 1 : index
    %c0_24 = arith.constant 0 : index
    %c0_25 = arith.constant 0 : index
    %57 = vector.load %arg3[%c1_23, %c0_24, %c0_25] : memref<9x8x128xf32, #tpu.memory_space<vmem>>, vector<1x8x128xf32>
    %58 = vector.shape_cast %57 : vector<1x8x128xf32> to vector<8x128xf32>
    %59 = vector.shape_cast %56 : vector<8x128xf32> to vector<1x8x128xf32>
    tpu.vector_store %arg3[%c1_23, %c0_24, %c0_25], %59 {strides = array<i32>} : memref<9x8x128xf32, #tpu.memory_space<vmem>>, vector<1x8x128xf32>,
    %c3_26 = arith.constant 3 : index
    %c0_27 = arith.constant 0 : index
    %c0_28 = arith.constant 0 : index
    %60 = vector.load %arg3[%c3_26, %c0_27, %c0_28] : memref<9x8x128xf32, #tpu.memory_space<vmem>>, vector<1x8x128xf32>
    %61 = vector.shape_cast %60 : vector<1x8x128xf32> to vector<8x128xf32>
    %62 = vector.shape_cast %56 : vector<8x128xf32> to vector<1x8x128xf32>
    tpu.vector_store %arg3[%c3_26, %c0_27, %c0_28], %62 {strides = array<i32>} : memref<9x8x128xf32, #tpu.memory_space<vmem>>, vector<1x8x128xf32>,
    %63 = arith.mulf %3, %15 : vector<8x128xf32>
    %64 = arith.mulf %5, %17 : vector<8x128xf32>
    %65 = arith.addf %63, %64 : vector<8x128xf32>
    %66 = arith.mulf %7, %19 : vector<8x128xf32>
    %67 = arith.addf %65, %66 : vector<8x128xf32>
    %68 = vector.broadcast %0 : f32 to vector<8x128xf32>
    %69 = arith.mulf %68, %67 : vector<8x128xf32>
    %c2_29 = arith.constant 2 : index
    %c0_30 = arith.constant 0 : index
    %c0_31 = arith.constant 0 : index
    %70 = vector.load %arg3[%c2_29, %c0_30, %c0_31] : memref<9x8x128xf32, #tpu.memory_space<vmem>>, vector<1x8x128xf32>
    %71 = vector.shape_cast %70 : vector<1x8x128xf32> to vector<8x128xf32>
    %72 = vector.shape_cast %69 : vector<8x128xf32> to vector<1x8x128xf32>
    tpu.vector_store %arg3[%c2_29, %c0_30, %c0_31], %72 {strides = array<i32>} : memref<9x8x128xf32, #tpu.memory_space<vmem>>, vector<1x8x128xf32>,
    %c6_32 = arith.constant 6 : index
    %c0_33 = arith.constant 0 : index
    %c0_34 = arith.constant 0 : index
    %73 = vector.load %arg3[%c6_32, %c0_33, %c0_34] : memref<9x8x128xf32, #tpu.memory_space<vmem>>, vector<1x8x128xf32>
    %74 = vector.shape_cast %73 : vector<1x8x128xf32> to vector<8x128xf32>
    %75 = vector.shape_cast %69 : vector<8x128xf32> to vector<1x8x128xf32>
    tpu.vector_store %arg3[%c6_32, %c0_33, %c0_34], %75 {strides = array<i32>} : memref<9x8x128xf32, #tpu.memory_space<vmem>>, vector<1x8x128xf32>,
    %76 = arith.mulf %9, %9 : vector<8x128xf32>
    %77 = arith.mulf %11, %11 : vector<8x128xf32>
    %78 = arith.addf %76, %77 : vector<8x128xf32>
    %79 = arith.mulf %13, %13 : vector<8x128xf32>
    %80 = arith.addf %78, %79 : vector<8x128xf32>
    %cst_35 = arith.constant 1.000000e+00 : f32
    %81 = vector.broadcast %cst_35 : f32 to vector<8x128xf32>
    %82 = arith.subf %80, %81 : vector<8x128xf32>
    %83 = vector.broadcast %0 : f32 to vector<8x128xf32>
    %84 = arith.mulf %83, %82 : vector<8x128xf32>
    %85 = arith.addf %84, %36 : vector<8x128xf32>
    %c4_36 = arith.constant 4 : index
    %c0_37 = arith.constant 0 : index
    %c0_38 = arith.constant 0 : index
    %86 = vector.load %arg3[%c4_36, %c0_37, %c0_38] : memref<9x8x128xf32, #tpu.memory_space<vmem>>, vector<1x8x128xf32>
    %87 = vector.shape_cast %86 : vector<1x8x128xf32> to vector<8x128xf32>
    %88 = vector.shape_cast %85 : vector<8x128xf32> to vector<1x8x128xf32>
    tpu.vector_store %arg3[%c4_36, %c0_37, %c0_38], %88 {strides = array<i32>} : memref<9x8x128xf32, #tpu.memory_space<vmem>>, vector<1x8x128xf32>,
    %89 = arith.mulf %9, %15 : vector<8x128xf32>
    %90 = arith.mulf %11, %17 : vector<8x128xf32>
    %91 = arith.addf %89, %90 : vector<8x128xf32>
    %92 = arith.mulf %13, %19 : vector<8x128xf32>
    %93 = arith.addf %91, %92 : vector<8x128xf32>
    %94 = vector.broadcast %0 : f32 to vector<8x128xf32>
    %95 = arith.mulf %94, %93 : vector<8x128xf32>
    %c5_39 = arith.constant 5 : index
    %c0_40 = arith.constant 0 : index
    %c0_41 = arith.constant 0 : index
    %96 = vector.load %arg3[%c5_39, %c0_40, %c0_41] : memref<9x8x128xf32, #tpu.memory_space<vmem>>, vector<1x8x128xf32>
    %97 = vector.shape_cast %96 : vector<1x8x128xf32> to vector<8x128xf32>
    %98 = vector.shape_cast %95 : vector<8x128xf32> to vector<1x8x128xf32>
    tpu.vector_store %arg3[%c5_39, %c0_40, %c0_41], %98 {strides = array<i32>} : memref<9x8x128xf32, #tpu.memory_space<vmem>>, vector<1x8x128xf32>,
    %c7_42 = arith.constant 7 : index
    %c0_43 = arith.constant 0 : index
    %c0_44 = arith.constant 0 : index
    %99 = vector.load %arg3[%c7_42, %c0_43, %c0_44] : memref<9x8x128xf32, #tpu.memory_space<vmem>>, vector<1x8x128xf32>
    %100 = vector.shape_cast %99 : vector<1x8x128xf32> to vector<8x128xf32>
    %101 = vector.shape_cast %95 : vector<8x128xf32> to vector<1x8x128xf32>
    tpu.vector_store %arg3[%c7_42, %c0_43, %c0_44], %101 {strides = array<i32>} : memref<9x8x128xf32, #tpu.memory_space<vmem>>, vector<1x8x128xf32>,
    %102 = arith.mulf %15, %15 : vector<8x128xf32>
    %103 = arith.mulf %17, %17 : vector<8x128xf32>
    %104 = arith.addf %102, %103 : vector<8x128xf32>
    %105 = arith.mulf %19, %19 : vector<8x128xf32>
    %106 = arith.addf %104, %105 : vector<8x128xf32>
    %cst_45 = arith.constant 1.000000e+00 : f32
    %107 = vector.broadcast %cst_45 : f32 to vector<8x128xf32>
    %108 = arith.subf %106, %107 : vector<8x128xf32>
    %109 = vector.broadcast %0 : f32 to vector<8x128xf32>
    %110 = arith.mulf %109, %108 : vector<8x128xf32>
    %111 = arith.addf %110, %36 : vector<8x128xf32>
    %c8_46 = arith.constant 8 : index
    %c0_47 = arith.constant 0 : index
    %c0_48 = arith.constant 0 : index
    %112 = vector.load %arg3[%c8_46, %c0_47, %c0_48] : memref<9x8x128xf32, #tpu.memory_space<vmem>>, vector<1x8x128xf32>
    %113 = vector.shape_cast %112 : vector<1x8x128xf32> to vector<8x128xf32>
    %114 = vector.shape_cast %111 : vector<8x128xf32> to vector<1x8x128xf32>
    tpu.vector_store %arg3[%c8_46, %c0_47, %c0_48], %114 {strides = array<i32>} : memref<9x8x128xf32, #tpu.memory_space<vmem>>, vector<1x8x128xf32>,
    return
  }
  func.func @transform_0(%arg0: i32) -> i32 {
    %c0_i32 = arith.constant 0 : i32
    %c0_i32_0 = arith.constant 0 : i32
    return %c0_i32 : i32
  }
  func.func @transform_1(%arg0: i32) -> (i32, i32, i32) {
    %c0_i32 = arith.constant 0 : i32
    %c0_i32_0 = arith.constant 0 : i32
    %c0_i32_1 = arith.constant 0 : i32
    return %c0_i32, %arg0, %c0_i32_0 : i32, i32, i32
  }
  func.func @transform_2(%arg0: i32) -> (i32, i32, i32) {
    %c0_i32 = arith.constant 0 : i32
    %c0_i32_0 = arith.constant 0 : i32
    %c0_i32_1 = arith.constant 0 : i32
    return %c0_i32, %arg0, %c0_i32_0 : i32, i32, i32
  }
}

</mosaic_0001>

<bundles_post_ra>
// kernel: physics_forward.1
= control target key start
LH: loop header
LB: loop body
LE: loop exit
PB: predicated region body
PF: predicated region fallthrough
CT: control target
= control target key end

     0   :  { %7 = vsyncpa [#allocation3], 0  ;;  %s163_s12 = smov [#allocation2]   ;;  %s239_s0 = inlined_call_operand.vmem [shape: f32[2], index: 0, kind: input, shape index: {}]   ;;  %s240_s1 = inlined_call_operand.vmem [shape: f32[9,8,128], index: 1, kind: input, shape index: {}]   ;;  %s241_s2 = inlined_call_operand.vmem [shape: f32[9,8,128], index: 2, kind: output, shape index: {}]  }
   0x1   :  { %s13_s11 = sshll.u32 %s239_s0, 4  ;;  %s14_s11 = int_to_ptr.vmem [resolvable:$true] %s13_s11 }
   0x2   :  { %16 = dma.vmem_to_smem %s14_s11, 16, %s163_s12, [#allocation3]  }
   0x3   :  { %161 = dma.done.wait [#allocation3], 16  }
   0x4   :  { %162 = vsyncadd [#allocation3], 4294967280 }
   0x5   :  { %23 = sfence }
   0x6   :  { %s182_s13 = sld [smem:[#allocation2]]  ;;  %v26_v0 = vld [vmem:[%s240_s1] sm:$0xff]  ;;  %v127_v1 = vld [vmem:[%s240_s1 + $0x8] sm:$0xff]  ;;  %v128_v2 = vld [vmem:[%s240_s1 + $0x10] sm:$0xff] }
   0x7   :  { %v129_v3 = vld [vmem:[%s240_s1 + $0x18] sm:$0xff]  ;;  %v130_v4 = vld [vmem:[%s240_s1 + $0x20] sm:$0xff]  ;;  %v131_v5 = vld [vmem:[%s240_s1 + $0x28] sm:$0xff]  ;;  %v61_v9 = vmul.f32 %v26_v0, %v26_v0  ;;  %v62_v19 = vmul.f32 %v127_v1, %v127_v1  ;;  %v64_v26 = vmul.f32 %v128_v2, %v128_v2  ;;  %s126_s4 = sld [smem:[#allocation2 + $0x1]] }
   0x8   :  { %v132_v6 = vld [vmem:[%s240_s1 + $0x30] sm:$0xff]  ;;  %v133_v7 = vld [vmem:[%s240_s1 + $0x38] sm:$0xff]  ;;  %v134_v8 = vld [vmem:[%s240_s1 + $0x40] sm:$0xff]  ;;  %v71_v10 = vmul.f32 %v129_v3, %v26_v0  ;;  %v72_v11 = vmul.f32 %v130_v4, %v127_v1  ;;  %v74_v12 = vmul.f32 %v131_v5, %v128_v2  ;;  %v91_v28 = vmul.f32 %v129_v3, %v129_v3 }
   0x9   :  { %v43_v13 = vmul.f32 %v134_v8, %v130_v4  ;;  %v44_v14 = vmul.f32 %v133_v7, %v131_v5  ;;  %v47_v15 = vmul.f32 %v134_v8, %v129_v3  ;;  %v48_v16 = vmul.f32 %v132_v6, %v131_v5 }
   0xa   :  { %v52_v17 = vmul.f32 %v133_v7, %v129_v3  ;;  %v53_v18 = vmul.f32 %v132_v6, %v130_v4  ;;  %v73_v20 = vadd.f32 %v72_v11, %v71_v10  ;;  %v81_v23 = vmul.f32 %v132_v6, %v26_v0 }
   0xb   :  { %v45_v21 = vsub.f32 %v43_v13, %v44_v14  ;;  %v49_v22 = vsub.f32 %v47_v15, %v48_v16  ;;  %v82_v24 = vmul.f32 %v133_v7, %v127_v1  ;;  %v63_v34 = vadd.f32 %v62_v19, %v61_v9 }
   0xc   :  { %v54_v25 = vsub.f32 %v52_v17, %v53_v18  ;;  %v75_v27 = vadd.f32 %v74_v12, %v73_v20  ;;  %v67_v31 = vstv %s182_s13  ;;  %v84_v36 = vmul.f32 %v134_v8, %v128_v2 }
   0xd   :  { %v46_v29 = vmul.f32 %v45_v21, %v26_v0  ;;  %v50_v30 = vmul.f32 %v127_v1, %v49_v22  ;;  %v83_v32 = vadd.f32 %v82_v24, %v81_v23  ;;  %v92_v38 = vmul.f32 %v130_v4, %v130_v4 }
   0xe   :  { %v55_v33 = vmul.f32 %v128_v2, %v54_v25  ;;  %v76_v35 = vmul.f32 %v75_v27, %v67_v31  ;;  %v94_v39 = vmul.f32 %v131_v5, %v131_v5  ;;  %v101_v40 = vmul.f32 %v132_v6, %v129_v3 }
   0xf   :  { %v51_v37 = vsub.f32 %v46_v29, %v50_v30  ;;  %v85_v41 = vadd.f32 %v84_v36, %v83_v32  ;;  %v102_v42 = vmul.f32 %v133_v7, %v130_v4  ;;  %v104_v43 = vmul.f32 %v134_v8, %v131_v5 }
  0x10   :  { %136 = vst [vmem:[%s241_s2 + $0x8] sm:$0xff] %v76_v35  ;;  %v93_v45 = vadd.f32 %v92_v38, %v91_v28  ;;  %v111_v46 = vmul.f32 %v132_v6, %v132_v6  ;;  %v112_v47 = vmul.f32 %v133_v7, %v133_v7  ;;  %v65_v48 = vadd.f32 %v64_v26, %v63_v34 }
  0x11   :  { %v56_v44 = vadd.f32 %v55_v33, %v51_v37  ;;  %137 = vst [vmem:[%s241_s2 + $0x18] sm:$0xff] %v76_v35  ;;  %v86_v49 = vmul.f32 %v85_v41, %v67_v31  ;;  %v103_v50 = vadd.f32 %v102_v42, %v101_v40  ;;  %v114_v51 = vmul.f32 %v134_v8, %v134_v8 }
  0x12   :  { %v95_v52 = vadd.f32 %v94_v39, %v93_v45  ;;  %v113_v53 = vadd.f32 %v112_v47, %v111_v46  ;;  %v135_v56 = vadd.f32 -1.0, %v65_v48  ;;  %v59_v61 = vstv %s126_s4 }
  0x13   :  { %147 = vlog2.f32 %v56_v44  ;;  %138 = vst [vmem:[%s241_s2 + $0x10] sm:$0xff] %v86_v49  ;;  %v105_v54 = vadd.f32 %v104_v43, %v103_v50 }
  0x14   :  { %139 = vst [vmem:[%s241_s2 + $0x30] sm:$0xff] %v86_v49  ;;  %v115_v55 = vadd.f32 %v114_v51, %v113_v53  ;;  %v140_v57 = vadd.f32 -1.0, %v95_v52  ;;  %v68_v63 = vmul.f32 %v135_v56, %v67_v31 }
  0x15   :  { %v106_v58 = vmul.f32 %v105_v54, %v67_v31 }
  0x16   :  { %v144_v59 = vadd.f32 -1.0, %v115_v55  ;;  %v97_v0 = vmul.f32 %v140_v57, %v67_v31 }
  0x17   :  { %142 = vst [vmem:[%s241_s2 + $0x28] sm:$0xff] %v106_v58 }
  0x18   :  { %143 = vst [vmem:[%s241_s2 + $0x38] sm:$0xff] %v106_v58  ;;  %v117_v1 = vmul.f32 %v144_v59, %v67_v31 }
  0x19   :  { %v148_v60 = vpop.eup %147 }
  0x1a   :  { %v58_v62 = vmul.f32 0.6931472, %v148_v60 }
  0x1c   :  { %v60_v2 = vmul.f32 %v59_v61, %v58_v62 }
  0x1e   :  { %v69_v3 = vadd.f32 %v68_v63, %v60_v2  ;;  %v98_v4 = vadd.f32 %v97_v0, %v60_v2  ;;  %v118_v5 = vadd.f32 %v117_v1, %v60_v2 }
  0x20   :  { %70 = vst [vmem:[%s241_s2] sm:$0xff] %v69_v3 }
  0x21   :  { %141 = vst [vmem:[%s241_s2 + $0x20] sm:$0xff] %v98_v4 }
  0x22   :  { %145 = vst [vmem:[%s241_s2 + $0x40] sm:$0xff] %v118_v5 }
  0x23   :  { %125 = vsyncpa [#allocation3], 1 }

</bundles_post_ra>
